<compile_context>
chip_gen: v7x
topology: tpu7x:2x2x1
jax: 0.10.0
libtpu: 0.0.40
codegen_flags: <defaults>
</compile_context>

<pallas_src>
import functools
from collections import namedtuple

import jax
import jax.numpy as jnp
from jax.experimental import pallas as pl
from jax.experimental.pallas import tpu as pltpu

# ----------------------------- model config ---------------------------------
Feature = namedtuple("Feature", ["name", "vocab_size", "embed_dim"])

WIDE_FEATURES = [Feature("w0", 10, 8), Feature("w1", 12, 8)]
DEEP_FEATURES = [Feature("d0", 20, 16), Feature("d1", 24, 16)]
NUM_DOMAINS = 3
MLP_DIMS = (32, 16)          # mlp_params = {"dims": [32, 16]}  (output_layer=True)
BN_EPS = 1e-5

WIDE_DIMS = sum(f.embed_dim for f in WIDE_FEATURES)   # 16
DEEP_DIMS = sum(f.embed_dim for f in DEEP_FEATURES)   # 32
FEAT_DIMS = WIDE_DIMS + DEEP_DIMS                     # 48

# dot_general dimension numbers for "lhs @ rhs.T" (lane-dense result).
TRANS_B = (((1,), (1,)), ((), ()))


# ------------------------------- kernel -------------------------------------
def widedeep_md_kernel(x_ref, dom_ref, w1_ref, b1_ref, w2_ref, b2_ref,
                       hx_ref, hh_ref, bh_ref, out_ref, *, num_domains):
    # x: [bm/P, P*48] bf16 -- P batch rows packed per MXU row.
    x = x_ref[...]

    # Shared MLP (eval-BN folded into W/b, block-diagonal over the P packed rows).
    # bf16 operands, f32 accumulation; bias/ReLU in f32.
    h = jnp.dot(x, w1_ref[...], preferred_element_type=jnp.float32) + b1_ref[...]
    h = jnp.maximum(h, 0.0).astype(jnp.bfloat16)             # [bm/P, P*32]
    h = jnp.dot(h, w2_ref[...], preferred_element_type=jnp.float32) + b2_ref[...]
    h2 = jnp.maximum(h, 0.0).astype(jnp.bfloat16)            # [bm/P, P*16]

    # Fused head: wide LR (on the zero-padded wide columns of x) + deep
    # projection, both as trans_b dots producing a lane-dense [P, bm/P] tile.
    logits = jax.lax.dot_general(hx_ref[...], x, TRANS_B,
                                 preferred_element_type=jnp.float32)
    logits = logits + jax.lax.dot_general(hh_ref[...], h2, TRANS_B,
                                          preferred_element_type=jnp.float32)
    logits = logits + bh_ref[0]                              # SMEM scalar (b_lr + b3)
    y = jax.nn.sigmoid(logits)                               # [P, bm/P] f32

    # Same shared network for every domain -> one masked select.
    dom = dom_ref[...]                                       # [P, bm/P] int32
    valid = jnp.logical_and(dom >= 0, dom < num_domains)
    out_ref[...] = jnp.where(valid, y, 0.0)


# ------------------------------ wrapper --------------------------------------
def embed(x, features, params):
    """EmbeddingLayer(..., squeeze_dim=True): concat per-feature embeddings -> [B, sum(embed_dim)]."""
    # TODO(synk): embedding gathers stay in XLA; dense kernel handles the per-row math.
    return jnp.concatenate(
        [jnp.take(params["emb"][f.name], x[f.name], axis=0) for f in features], axis=1)


def _default_pack():
    """4 rows/MXU-row on 256-wide MXUs (v6e/v7x); 2 on v5e's 128-wide MXU."""
    try:
        kind = jax.devices()[0].device_kind.lower()
    except Exception:
        return 4
    if "v5e" in kind or "v5 lite" in kind or "v5lite" in kind:
        return 2
    return 4


def _block_diag(w, pack):
    """[k, n] -> block-diagonal [pack*k, pack*n] (built once at trace time)."""
    k, n = w.shape
    eye = jnp.eye(pack, dtype=w.dtype)
    return (eye[:, None, :, None] * w[None, :, None, :]).reshape(pack * k, pack * n)


def _fold_and_pack_params(p, pack):
    """Fold eval-BN into the linears, zero-pad to full-row inputs, block-diag pack."""
    h1, h2 = MLP_DIMS
    s1 = p["g1"] * jax.lax.rsqrt(p["v1"] + BN_EPS)                 # [1, h1]
    w1f = p["w1"] * s1                                             # [deep, h1]
    b1f = (p["b1"] - p["m1"]) * s1 + p["be1"]                      # [1, h1]
    s2 = p["g2"] * jax.lax.rsqrt(p["v2"] + BN_EPS)                 # [1, h2]
    w2f = p["w2"] * s2                                             # [h1, h2]
    b2f = (p["b2"] - p["m2"]) * s2 + p["be2"]                      # [1, h2]

    # Zero-pad so the full [., 48] packed rows feed both branches (no in-kernel
    # column slices / concat): w1 ignores the wide columns, w_lr ignores the deep.
    w1_full = jnp.concatenate([jnp.zeros((WIDE_DIMS, h1), jnp.float32), w1f], axis=0)       # [48, h1]
    wlr_full = jnp.concatenate([p["w_lr"], jnp.zeros((DEEP_DIMS, 1), jnp.float32)], axis=0)  # [48, 1]

    w1bd = _block_diag(w1_full, pack).astype(jnp.bfloat16)         # [P*48, P*h1]
    w2bd = _block_diag(w2f, pack).astype(jnp.bfloat16)             # [P*h1, P*h2]
    hx = _block_diag(wlr_full, pack).T.astype(jnp.bfloat16)        # [P, P*48]
    hh = _block_diag(p["w3"], pack).T.astype(jnp.bfloat16)         # [P, P*h2]
    b1bd = jnp.tile(b1f, (1, pack))                                # [1, P*h1] f32
    b2bd = jnp.tile(b2f, (1, pack))                                # [1, P*h2] f32
    b_head = (p["b_lr"] + p["b3"]).reshape(1)                      # (1,) f32 scalar (SMEM)
    return w1bd, b1bd, w2bd, b2bd, hx, hh, b_head


def _choose_tile(B, pack, bm_max):
    """Pick bm (multiple of 128*pack) minimizing padding; prefer even #tiles, then bigger bm."""
    gran = 128 * pack
    bm_max = max(gran, (bm_max // gran) * gran)
    best_key, best = None, None
    for bm in range(gran, bm_max + 1, gran):
        nt = -(-B // bm)
        key = (nt * bm, nt % 2, -bm)     # (total padded rows, odd-tile penalty, -bm)
        if best_key is None or key < best_key:
            best_key, best = key, (bm, nt)
    return best


def widedeep_md_forward(x, params, *, bm_max=2048, pack=None):
    if pack is None:
        pack = _default_pack()

    input_wide = embed(x, WIDE_FEATURES, params)                   # [B, 16] f32
    input_deep = embed(x, DEEP_FEATURES, params)                   # [B, 32] f32
    domain = x["domain_indicator"].astype(jnp.int32)               # [B]
    B = input_wide.shape[0]

    w1bd, b1bd, w2bd, b2bd, hx, hh, b_head = _fold_and_pack_params(params, pack)

    bm, num_tiles = _choose_tile(B, pack, bm_max)
    B_pad = bm * num_tiles
    bp = bm // pack                                                # rows per tile after packing

    x_all = jnp.concatenate([input_wide, input_deep], axis=1)      # [B, 48] f32
    pad = B_pad - B
    if pad:
        x_all = jnp.pad(x_all, ((0, pad), (0, 0)))
        domain = jnp.pad(domain, (0, pad), constant_values=-1)     # pad rows -> masked to 0

    # Pack `pack` consecutive rows per MXU row (free row-major view), bf16 operands.
    x_packed = x_all.reshape(B_pad // pack, pack * FEAT_DIMS).astype(jnp.bfloat16)
    dom_packed = domain.reshape(B_pad // pack, pack).T             # [P, B_pad/P] int32

    kernel = functools.partial(widedeep_md_kernel, num_domains=NUM_DOMAINS)

    out = pl.pallas_call(
        kernel,
        out_shape=jax.ShapeDtypeStruct((pack, B_pad // pack), jnp.float32),
        grid=(num_tiles,),
        in_specs=[
            pl.BlockSpec((bp, pack * FEAT_DIMS), lambda i: (i, 0)),  # packed activations
            pl.BlockSpec((pack, bp), lambda i: (0, i)),              # packed domain ids
            pl.BlockSpec(w1bd.shape, lambda i: (0, 0)),              # resident weights
            pl.BlockSpec(b1bd.shape, lambda i: (0, 0)),
            pl.BlockSpec(w2bd.shape, lambda i: (0, 0)),
            pl.BlockSpec(b2bd.shape, lambda i: (0, 0)),
            pl.BlockSpec(hx.shape, lambda i: (0, 0)),
            pl.BlockSpec(hh.shape, lambda i: (0, 0)),
            pl.BlockSpec(memory_space=pltpu.MemorySpace.SMEM),       # scalar head bias
        ],
        out_specs=pl.BlockSpec((pack, bp), lambda i: (0, i)),        # lane-dense output slab
        compiler_params=pltpu.CompilerParams(dimension_semantics=("parallel",)),
    )(x_packed, dom_packed, w1bd, b1bd, w2bd, b2bd, hx, hh, b_head)

    # Un-pack: out[j, i] is the result for batch row pack*i + j.
    return out.T.reshape(-1)[:B]                                   # final.squeeze(1) -> [B]


# ------------------------- pure-JAX reference --------------------------------
def widedeep_md_reference(x, params):
    p = params
    input_wide = embed(x, WIDE_FEATURES, p)
    input_deep = embed(x, DEEP_FEATURES, p)
    y_wide = input_wide @ p["w_lr"] + p["b_lr"]
    h = input_deep @ p["w1"] + p["b1"]
    h = jnp.maximum((h - p["m1"]) / jnp.sqrt(p["v1"] + BN_EPS) * p["g1"] + p["be1"], 0.0)
    h = h @ p["w2"] + p["b2"]
    h = jnp.maximum((h - p["m2"]) / jnp.sqrt(p["v2"] + BN_EPS) * p["g2"] + p["be2"], 0.0)
    y_deep = h @ p["w3"] + p["b3"]
    y = jax.nn.sigmoid(y_wide + y_deep)
    domain = x["domain_indicator"].astype(jnp.int32)
    final = jnp.zeros_like(y)
    for d in range(NUM_DOMAINS):
        final = jnp.where((domain == d)[:, None], y, final)
    return final[:, 0]


# ----------------------------- params / data ---------------------------------
def init_params(key):
    keys = iter(jax.random.split(key, 16))
    params = {}
    params["emb"] = {
        f.name: 0.1 * jax.random.normal(next(keys), (f.vocab_size, f.embed_dim), jnp.float32)
        for f in WIDE_FEATURES + DEEP_FEATURES
    }
    # LR: Linear(wide_dims, 1)
    params["w_lr"] = 0.1 * jax.random.normal(next(keys), (WIDE_DIMS, 1), jnp.float32)
    params["b_lr"] = jnp.zeros((1, 1), jnp.float32)
    # MLP: Linear(DEEP_DIMS, 32) -> BN -> ReLU -> Linear(32, 16) -> BN -> ReLU -> Linear(16, 1)
    h1, h2 = MLP_DIMS
    params["w1"] = 0.1 * jax.random.normal(next(keys), (DEEP_DIMS, h1), jnp.float32)
    params["b1"] = 0.01 * jnp.ones((1, h1), jnp.float32)
    params["g1"] = 1.0 + 0.05 * jax.random.normal(next(keys), (1, h1), jnp.float32)
    params["be1"] = 0.02 * jnp.ones((1, h1), jnp.float32)
    params["m1"] = 0.05 * jax.random.normal(next(keys), (1, h1), jnp.float32)   # BN running mean
    params["v1"] = 1.0 + 0.1 * jnp.abs(jax.random.normal(next(keys), (1, h1), jnp.float32))
    params["w2"] = 0.1 * jax.random.normal(next(keys), (h1, h2), jnp.float32)
    params["b2"] = 0.01 * jnp.ones((1, h2), jnp.float32)
    params["g2"] = 1.0 + 0.05 * jax.random.normal(next(keys), (1, h2), jnp.float32)
    params["be2"] = jnp.zeros((1, h2), jnp.float32)
    params["m2"] = 0.05 * jax.random.normal(next(keys), (1, h2), jnp.float32)
    params["v2"] = 1.0 + 0.1 * jnp.abs(jax.random.normal(next(keys), (1, h2), jnp.float32))
    params["w3"] = 0.1 * jax.random.normal(next(keys), (h2, 1), jnp.float32)
    params["b3"] = jnp.zeros((1, 1), jnp.float32)
    return params


def make_inputs(key, B):
    dkeys = jax.random.split(key, len(WIDE_FEATURES) + len(DEEP_FEATURES) + 1)
    x = {}
    for i, f in enumerate(WIDE_FEATURES + DEEP_FEATURES):
        x[f.name] = jax.random.randint(dkeys[i], (B,), 0, f.vocab_size, dtype=jnp.int32)
    x["domain_indicator"] = jax.random.randint(dkeys[-1], (B,), 0, NUM_DOMAINS, dtype=jnp.int32)
    return x


if __name__ == "__main__":
    root = jax.random.PRNGKey(0)
    pkey, dkey1, dkey2, dkey3 = jax.random.split(root, 4)
    params = init_params(pkey)

    # bf16 MXU operands (f32 accumulation) -> loosen tolerance vs. f32 reference.
    TOL = 2e-2

    # case 1: small batch, multiple of 8
    x = make_inputs(dkey1, 16)
    out = jax.block_until_ready(widedeep_md_forward(x, params))
    ref = widedeep_md_reference(x, params)
    assert out.shape == (16,)
    assert jnp.allclose(out, ref, atol=TOL), (out, ref)

    # case 2: ragged batch exercises the zero-pad / domain=-1 masked-tail path
    x2 = make_inputs(dkey2, 13)
    out2 = jax.block_until_ready(widedeep_md_forward(x2, params))
    ref2 = widedeep_md_reference(x2, params)
    assert out2.shape == (13,)
    assert jnp.allclose(out2, ref2, atol=TOL), (out2, ref2)

    # case 3: multi-tile grid + explicit pack=2 (v5e-style) path
    x3 = make_inputs(dkey3, 300)
    out3 = jax.block_until_ready(widedeep_md_forward(x3, params, bm_max=256, pack=2))
    ref3 = widedeep_md_reference(x3, params)
    assert out3.shape == (300,)
    assert jnp.allclose(out3, ref3, atol=TOL), (out3, ref3)

    print("KERNEL_OK")
</pallas_src>

<mosaic_0001>
module attributes {stable_mosaic.version = 11 : i64} {
  func.func @widedeep_md_kernel(%arg0: i32, %arg1: memref<128x192xbf16, #tpu.memory_space<vmem>>, %arg2: memref<4x128xi32, #tpu.memory_space<vmem>>, %arg3: memref<192x128xbf16, #tpu.memory_space<vmem>>, %arg4: memref<1x128xf32, #tpu.memory_space<vmem>>, %arg5: memref<128x64xbf16, #tpu.memory_space<vmem>>, %arg6: memref<1x64xf32, #tpu.memory_space<vmem>>, %arg7: memref<4x192xbf16, #tpu.memory_space<vmem>>, %arg8: memref<4x64xbf16, #tpu.memory_space<vmem>>, %arg9: memref<1xf32, #tpu.memory_space<smem>>, %arg10: memref<4x128xf32, #tpu.memory_space<vmem>>) attributes {dimension_semantics = [#tpu.dimension_semantics<parallel>], iteration_bounds = array<i64: 1>, scalar_prefetch = 0 : i64, scratch_operands = 0 : i64, tpu.core_type = #tpu.core_type<tc>, window_params = [{transform_indices = @transform_0, window_bounds = array<i64: 128, 192>}, {transform_indices = @transform_1, window_bounds = array<i64: 4, 128>}, {pipeline_mode = #tpu.pipeline_mode<synchronous>, transform_indices = @transform_2, window_bounds = array<i64: 192, 128>}, {pipeline_mode = #tpu.pipeline_mode<synchronous>, transform_indices = @transform_3, window_bounds = array<i64: 1, 128>}, {pipeline_mode = #tpu.pipeline_mode<synchronous>, transform_indices = @transform_4, window_bounds = array<i64: 128, 64>}, {pipeline_mode = #tpu.pipeline_mode<synchronous>, transform_indices = @transform_5, window_bounds = array<i64: 1, 64>}, {pipeline_mode = #tpu.pipeline_mode<synchronous>, transform_indices = @transform_6, window_bounds = array<i64: 4, 192>}, {pipeline_mode = #tpu.pipeline_mode<synchronous>, transform_indices = @transform_7, window_bounds = array<i64: 4, 64>}, {transform_indices = @transform_8, window_bounds = array<i64: 1>}, {transform_indices = @transform_9, window_bounds = array<i64: 4, 128>}]} {
    %c0 = arith.constant 0 : index
    %c0_0 = arith.constant 0 : index
    %0 = vector.load %arg1[%c0, %c0_0] : memref<128x192xbf16, #tpu.memory_space<vmem>>, vector<128x192xbf16>
    %c0_1 = arith.constant 0 : index
    %c0_2 = arith.constant 0 : index
    %1 = vector.load %arg3[%c0_1, %c0_2] : memref<192x128xbf16, #tpu.memory_space<vmem>>, vector<192x128xbf16>
    %cst = arith.constant dense<0.000000e+00> : vector<128x128xf32>
    %2 = tpu.matmul %0, %1, %cst {dimension_numbers = #tpu.dot_dimension_numbers<[1], [0], [0], [1], [0, 0, 1, 1], [], []>} : vector<128x192xbf16>, vector<192x128xbf16>, vector<128x128xf32> -> vector<128x128xf32>
    %c0_3 = arith.constant 0 : index
    %c0_4 = arith.constant 0 : index
    %3 = vector.load %arg4[%c0_3, %c0_4] : memref<1x128xf32, #tpu.memory_space<vmem>>, vector<1x128xf32>
    %4 = vector.broadcast %3 : vector<1x128xf32> to vector<128x128xf32>
    %5 = arith.addf %2, %4 : vector<128x128xf32>
    %cst_5 = arith.constant 0.000000e+00 : f32
    %6 = vector.broadcast %cst_5 : f32 to vector<128x128xf32>
    %7 = arith.maximumf %5, %6 : vector<128x128xf32>
    %8 = arith.truncf %7 : vector<128x128xf32> to vector<128x128xbf16>
    %c0_6 = arith.constant 0 : index
    %c0_7 = arith.constant 0 : index
    %9 = vector.load %arg5[%c0_6, %c0_7] : memref<128x64xbf16, #tpu.memory_space<vmem>>, vector<128x64xbf16>
    %cst_8 = arith.constant dense<0.000000e+00> : vector<128x64xf32>
    %10 = tpu.matmul %8, %9, %cst_8 {dimension_numbers = #tpu.dot_dimension_numbers<[1], [0], [0], [1], [0, 0, 1, 1], [], []>} : vector<128x128xbf16>, vector<128x64xbf16>, vector<128x64xf32> -> vector<128x64xf32>
    %c0_9 = arith.constant 0 : index
    %c0_10 = arith.constant 0 : index
    %11 = vector.load %arg6[%c0_9, %c0_10] : memref<1x64xf32, #tpu.memory_space<vmem>>, vector<1x64xf32>
    %12 = vector.broadcast %11 : vector<1x64xf32> to vector<128x64xf32>
    %13 = arith.addf %10, %12 : vector<128x64xf32>
    %cst_11 = arith.constant 0.000000e+00 : f32
    %14 = vector.broadcast %cst_11 : f32 to vector<128x64xf32>
    %15 = arith.maximumf %13, %14 : vector<128x64xf32>
    %16 = arith.truncf %15 : vector<128x64xf32> to vector<128x64xbf16>
    %c0_12 = arith.constant 0 : index
    %c0_13 = arith.constant 0 : index
    %17 = vector.load %arg7[%c0_12, %c0_13] : memref<4x192xbf16, #tpu.memory_space<vmem>>, vector<4x192xbf16>
    %cst_14 = arith.constant dense<0.000000e+00> : vector<4x128xf32>
    %18 = tpu.matmul %17, %0, %cst_14 {dimension_numbers = #tpu.dot_dimension_numbers<[1], [1], [0], [0], [0, 0, 1, 0], [], []>} : vector<4x192xbf16>, vector<128x192xbf16>, vector<4x128xf32> -> vector<4x128xf32>
    %c0_15 = arith.constant 0 : index
    %c0_16 = arith.constant 0 : index
    %19 = vector.load %arg8[%c0_15, %c0_16] : memref<4x64xbf16, #tpu.memory_space<vmem>>, vector<4x64xbf16>
    %cst_17 = arith.constant dense<0.000000e+00> : vector<4x128xf32>
    %20 = tpu.matmul %19, %16, %cst_17 {dimension_numbers = #tpu.dot_dimension_numbers<[1], [1], [0], [0], [0, 0, 1, 0], [], []>} : vector<4x64xbf16>, vector<128x64xbf16>, vector<4x128xf32> -> vector<4x128xf32>
    %21 = arith.addf %18, %20 : vector<4x128xf32>
    %c0_18 = arith.constant 0 : index
    %22 = memref.load %arg9[%c0_18] : memref<1xf32, #tpu.memory_space<smem>>
    %23 = vector.broadcast %22 : f32 to vector<4x128xf32>
    %24 = arith.addf %21, %23 : vector<4x128xf32>
    %25 = arith.negf %24 : vector<4x128xf32>
    %26 = math.exp %25 : vector<4x128xf32>
    %cst_19 = arith.constant 1.000000e+00 : f32
    %27 = vector.broadcast %cst_19 : f32 to vector<4x128xf32>
    %28 = arith.addf %27, %26 : vector<4x128xf32>
    %29 = arith.divf %27, %28 : vector<4x128xf32>
    %c0_20 = arith.constant 0 : index
    %c0_21 = arith.constant 0 : index
    %30 = vector.load %arg2[%c0_20, %c0_21] : memref<4x128xi32, #tpu.memory_space<vmem>>, vector<4x128xi32>
    %c0_i32 = arith.constant 0 : i32
    %31 = vector.broadcast %c0_i32 : i32 to vector<4x128xi32>
    %32 = arith.cmpi sge, %30, %31 : vector<4x128xi32>
    %c3_i32 = arith.constant 3 : i32
    %33 = vector.broadcast %c3_i32 : i32 to vector<4x128xi32>
    %34 = arith.cmpi slt, %30, %33 : vector<4x128xi32>
    %35 = arith.andi %32, %34 : vector<4x128xi1>
    %cst_22 = arith.constant 0.000000e+00 : f32
    %36 = vector.broadcast %cst_22 : f32 to vector<4x128xf32>
    %37 = arith.select %35, %29, %36 : vector<4x128xi1>, vector<4x128xf32>
    %c0_23 = arith.constant 0 : index
    %c0_24 = arith.constant 0 : index
    %38 = vector.load %arg10[%c0_23, %c0_24] : memref<4x128xf32, #tpu.memory_space<vmem>>, vector<4x128xf32>
    tpu.vector_store %arg10[%c0_23, %c0_24], %37 {strides = array<i32>} : memref<4x128xf32, #tpu.memory_space<vmem>>, vector<4x128xf32>,
    return
  }
  func.func @transform_0(%arg0: i32) -> (i32, i32) {
    %c0_i32 = arith.constant 0 : i32
    %c0_i32_0 = arith.constant 0 : i32
    return %arg0, %c0_i32 : i32, i32
  }
  func.func @transform_1(%arg0: i32) -> (i32, i32) {
    %c0_i32 = arith.constant 0 : i32
    %c0_i32_0 = arith.constant 0 : i32
    return %c0_i32, %arg0 : i32, i32
  }
  func.func @transform_2(%arg0: i32) -> (i32, i32) {
    %c0_i32 = arith.constant 0 : i32
    %c0_i32_0 = arith.constant 0 : i32
    %c0_i32_1 = arith.constant 0 : i32
    return %c0_i32, %c0_i32_0 : i32, i32
  }
  func.func @transform_3(%arg0: i32) -> (i32, i32) {
    %c0_i32 = arith.constant 0 : i32
    %c0_i32_0 = arith.constant 0 : i32
    %c0_i32_1 = arith.constant 0 : i32
    return %c0_i32, %c0_i32_0 : i32, i32
  }
  func.func @transform_4(%arg0: i32) -> (i32, i32) {
    %c0_i32 = arith.constant 0 : i32
    %c0_i32_0 = arith.constant 0 : i32
    %c0_i32_1 = arith.constant 0 : i32
    return %c0_i32, %c0_i32_0 : i32, i32
  }
  func.func @transform_5(%arg0: i32) -> (i32, i32) {
    %c0_i32 = arith.constant 0 : i32
    %c0_i32_0 = arith.constant 0 : i32
    %c0_i32_1 = arith.constant 0 : i32
    return %c0_i32, %c0_i32_0 : i32, i32
  }
  func.func @transform_6(%arg0: i32) -> (i32, i32) {
    %c0_i32 = arith.constant 0 : i32
    %c0_i32_0 = arith.constant 0 : i32
    %c0_i32_1 = arith.constant 0 : i32
    return %c0_i32, %c0_i32_0 : i32, i32
  }
  func.func @transform_7(%arg0: i32) -> (i32, i32) {
    %c0_i32 = arith.constant 0 : i32
    %c0_i32_0 = arith.constant 0 : i32
    %c0_i32_1 = arith.constant 0 : i32
    return %c0_i32, %c0_i32_0 : i32, i32
  }
  func.func @transform_8(%arg0: i32) -> i32 {
    %c0_i32 = arith.constant 0 : i32
    %c0_i32_0 = arith.constant 0 : i32
    return %c0_i32 : i32
  }
  func.func @transform_9(%arg0: i32) -> (i32, i32) {
    %c0_i32 = arith.constant 0 : i32
    %c0_i32_0 = arith.constant 0 : i32
    return %c0_i32, %arg0 : i32, i32
  }
}

</mosaic_0001>

<bundles_post_ra>
// kernel: tpu_custom_call.1
= control target key start
LH: loop header
LB: loop body
LE: loop exit
PB: predicated region body
PF: predicated region fallthrough
CT: control target
= control target key end

     0   :  { %v926_v1 = vmov 0   ;;  %vm226_vm0 = vcmask 523264   ;;  %s1189_s0 = inlined_call_operand.vmem [shape: bf16[128,192], index: 0, kind: input, shape index: {}]   ;;  %s1190_s1 = inlined_call_operand.vmem [shape: s32[4,128], index: 1, kind: input, shape index: {}]   ;;  %s1191_s2 = inlined_call_operand.vmem [shape: bf16[192,128], index: 2, kind: input, shape index: {}]   ;;  %s1192_s3 = inlined_call_operand.vmem [shape: f32[1,128], index: 3, kind: input, shape index: {}]   ;;  %s1193_s4 = inlined_call_operand.vmem [shape: bf16[128,64], index: 4, kind: input, shape index: {}]   ;;  %s1194_s5 = inlined_call_operand.vmem [shape: f32[1,64], index: 5, kind: input, shape index: {}]   ;;  %s1195_s6 = inlined_call_operand.vmem [shape: bf16[4,192], index: 6, kind: input, shape index: {}]   ;;  %s1196_s7 = inlined_call_operand.vmem [shape: bf16[4,64], index: 7, kind: input, shape index: {}]   ;;  %s1197_s8 = inlined_call_operand.<no memory space> [shape: f32[1], index: 8, kind: input, shape index: {}]   ;;  %s1198_s9 = inlined_call_operand.hbm [shape: f32[4,128], index: 9, kind: output, shape index: {}]  }
   0x1   :  { %v854_v0 = vld [vmem:[%s1191_s2] sm:$0xff]   ;;  %251 = vmatprep.subr.bf16.mxu0 %v926_v1  ;;  %v855_v2 = vld [vmem:[%s1191_s2 + $0x8] sm:$0xff]   ;;  %v856_v3 = vld [vmem:[%s1191_s2 + $0x10] sm:$0xff]  }
   0x2   :  { %252 = vmatpush1.bf16.msra.mxu0 %v854_v0  ;;  %v857_v4 = vld [vmem:[%s1191_s2 + $0x18] sm:$0xff]   ;;  %v868_v5 = vld [vmem:[%s1189_s0 + $0x4] ss:$8 sps:$4 sm:$0xff]   ;;  %v860_v8 = vld [vmem:[%s1191_s2 + $0x30] sm:$0xff]  }
   0x3   :  { %253 = vmatprep.subr.bf16.mxu0 %v926_v1  ;;  %v858_v6 = vld [vmem:[%s1191_s2 + $0x20] sm:$0xff]   ;;  %744 = vmatprep.mubr.msk.bf16.mxu0 %vm226_vm0, %v868_v5  ;;  %v859_v7 = vld [vmem:[%s1191_s2 + $0x28] sm:$0xff]   ;;  %v861_v11 = vld [vmem:[%s1191_s2 + $0x38] sm:$0xff]  }
   0x4   :  { %v890_v9 = vld [vmem:[%s1193_s4] sm:$0xff]   ;;  %v891_v10 = vld [vmem:[%s1193_s4 + $0x8] sm:$0xff]   ;;  %v892_v12 = vld [vmem:[%s1193_s4 + $0x10] sm:$0xff]  }
   0x5   :  { %798 = vmatprep.subr.bf16.mxu1 %v890_v9 }
   0x6   :  { %254 = vmatpush1.bf16.msra.mxu0 %v855_v2  ;;  %799 = vmatpush3.bf16.msra.mxu1 %v890_v9 }
   0x7   :  { %255 = vmatprep.subr.bf16.mxu0 %v926_v1  ;;  %800 = vmatprep.subr.bf16.mxu1 %v891_v10 }
   0xa   :  { %256 = vmatpush1.bf16.msra.mxu0 %v856_v3 }
   0xb   :  { %257 = vmatprep.subr.bf16.mxu0 %v926_v1 }
   0xe   :  { %258 = vmatpush1.bf16.msra.mxu0 %v857_v4 }
   0xf   :  { %259 = vmatprep.subr.bf16.mxu0 %v926_v1 }
  0x12   :  { %260 = vmatpush1.bf16.msra.mxu0 %v858_v6 }
  0x13   :  { %261 = vmatprep.subr.bf16.mxu0 %v926_v1 }
  0x16   :  { %262 = vmatpush1.bf16.msra.mxu0 %v859_v7 }
  0x17   :  { %263 = vmatprep.subr.bf16.mxu0 %v926_v1 }
  0x1a   :  { %264 = vmatpush1.bf16.msra.mxu0 %v860_v8 }
  0x1b   :  { %265 = vmatprep.subr.bf16.mxu0 %v926_v1 }
  0x1c   :  { %15 = vsyncpa [#allocation4], 0  ;;  %v862_v13 = vld [vmem:[%s1191_s2 + $0x40] sm:$0xff]   ;;  %801 = vmatpush3.bf16.msra.mxu1 %v891_v10  ;;  %v893_v14 = vld [vmem:[%s1193_s4 + $0x18] sm:$0xff]   ;;  %vm928_vm1 = vmmov 0   ;;  %s929_s22 = smov [#allocation3]  }
  0x1d   :  { %802 = vmatprep.subr.bf16.mxu1 %v892_v12  ;;  %v863_v15 = vld [vmem:[%s1191_s2 + $0x48] sm:$0xff]   ;;  %v864_v16 = vld [vmem:[%s1191_s2 + $0x50] sm:$0xff]   ;;  %v865_v17 = vld [vmem:[%s1191_s2 + $0x58] sm:$0xff]   ;;  %s707_s23 = sshll.u32 %s929_s22, 4  ;;  %s708_s23 = int_to_ptr.vmem [resolvable:$true] %s707_s23 }
  0x1e   :  { %266 = vmatpush1.bf16.msra.mxu0 %v861_v11  ;;  %v866_v18 = vld [vmem:[%s1189_s0] ss:$8 sps:$4 sm:$0xff]   ;;  %v869_v19 = vld [vmem:[%s1189_s0 + $0x14] ss:$8 sps:$4 sm:$0xff]   ;;  %v871_v20 = vld [vmem:[%s1189_s0 + $0x10] ss:$8 sps:$4 sm:$0xff]   ;;  %p907_p1 = scmp.lt.s32.totalorder %s708_s23, %s708_s23 }
  0x1f   :  { %267 = vmatprep.subr.bf16.mxu0 %v926_v1  ;;  %v872_v21 = vld [vmem:[%s1189_s0 + $0x24] ss:$8 sps:$4 sm:$0xff]   ;;  %v874_v22 = vld [vmem:[%s1189_s0 + $0x20] ss:$8 sps:$4 sm:$0xff]   ;;  %v875_v23 = vld [vmem:[%s1189_s0 + $0x34] ss:$8 sps:$4 sm:$0xff]  }
  0x20   :  { %803 = vmatpush3.bf16.msra.mxu1 %v892_v12  ;;  %v877_v24 = vld [vmem:[%s1189_s0 + $0x30] ss:$8 sps:$4 sm:$0xff]   ;;  %v878_v25 = vld [vmem:[%s1189_s0 + $0x44] ss:$8 sps:$4 sm:$0xff]   ;;  %v880_v26 = vld [vmem:[%s1189_s0 + $0x40] ss:$8 sps:$4 sm:$0xff]  }
  0x21   :  { %804 = vmatprep.subr.bf16.mxu1 %v893_v14  ;;  %v881_v27 = vld [vmem:[%s1189_s0 + $0x54] ss:$8 sps:$4 sm:$0xff]   ;;  %v883_v28 = vld [vmem:[%s1189_s0 + $0x50] ss:$8 sps:$4 sm:$0xff]   ;;  %v884_v29 = vld [vmem:[%s1189_s0 + $0x64] ss:$8 sps:$4 sm:$0xff]  }
  0x22   :  { %268 = vmatpush1.bf16.msra.mxu0 %v862_v13  ;;  %v886_v30 = vld [vmem:[%s1189_s0 + $0x60] ss:$8 sps:$4 sm:$0xff]   ;;  %v887_v31 = vld [vmem:[%s1189_s0 + $0x74] ss:$8 sps:$4 sm:$0xff]   ;;  %v889_v32 = vld [vmem:[%s1189_s0 + $0x70] ss:$8 sps:$4 sm:$0xff]  }
  0x23   :  { %269 = vmatprep.subr.bf16.mxu0 %v926_v1  ;;  %v894_v33 = vld [vmem:[%s1193_s4 + $0x20] sm:$0xff]   ;;  %v895_v34 = vld [vmem:[%s1193_s4 + $0x28] sm:$0xff]   ;;  %v896_v35 = vld [vmem:[%s1193_s4 + $0x30] sm:$0xff]  }
  0x24   :  { %805 = vmatpush3.bf16.msra.mxu1 %v893_v14  ;;  %v897_v36 = vld [vmem:[%s1193_s4 + $0x38] sm:$0xff]   ;;  %v1107_v37 = vld [vmem:[%s1192_s3] ss:$0 sm:$0xff] }
  0x25   :  { %806 = vmatprep.subr.bf16.mxu1 %v894_v33 }
  0x26   :  { %270 = vmatpush1.bf16.msra.mxu0 %v863_v15 }
  0x27   :  { %271 = vmatprep.subr.bf16.mxu0 %v926_v1 }
  0x28   :  { %807 = vmatpush3.bf16.msra.mxu1 %v894_v33 }
  0x29   :  { %808 = vmatprep.subr.bf16.mxu1 %v895_v34 }
  0x2a   :  { %272 = vmatpush1.bf16.msra.mxu0 %v864_v16 }
  0x2b   :  { %273 = vmatprep.subr.bf16.mxu0 %v926_v1 }
  0x2c   :  { %809 = vmatpush3.bf16.msra.mxu1 %v895_v34 }
  0x2d   :  { %810 = vmatprep.subr.bf16.mxu1 %v896_v35 }
  0x2e   :  { %274 = vmatpush1.bf16.msra.mxu0 %v865_v17 }
  0x2f   :  { %763 = vmatprep.subr.msk.bf16.mxu0 %vm226_vm0, %v868_v5 }
  0x30   :  { %811 = vmatpush3.bf16.msra.mxu1 %v896_v35 }
  0x31   :  { %284 = vmatmul.mubr.bf16.vlgmr.msra.gmra.mrb[0].mxu0 %v866_v18  ;;  %812 = vmatprep.subr.bf16.mxu1 %v897_v36 }
  0x32   :  { %745 = vmatprep.mubr.msk.bf16.mxu0 %vm226_vm0, %v869_v19 }
  0x34   :  { %813 = vmatpush3.bf16.msra.mxu1 %v897_v36 }
  0x37   :  { %647 = vmatpush1.bf16.xpose.msra.mxu0 %v866_v18 }
  0x38   :  { %764 = vmatprep.subr.msk.bf16.mxu0 %vm226_vm0, %v869_v19 }
  0x39   :  { %292 = vmatmul.mubr.bf16.gmra.mrb[4].mxu0 %v871_v20 }
  0x3a   :  { %746 = vmatprep.mubr.msk.bf16.mxu0 %vm226_vm0, %v872_v21 }
  0x3f   :  { %649 = vmatpush1.bf16.xpose.msra.mxu0 %v871_v20 }
  0x40   :  { %765 = vmatprep.subr.msk.bf16.mxu0 %vm226_vm0, %v872_v21 }
  0x41   :  { %300 = vmatmul.mubr.bf16.gmra.mrb[8].mxu0 %v874_v22 }
  0x42   :  { %747 = vmatprep.mubr.msk.bf16.mxu0 %vm226_vm0, %v875_v23 }
  0x47   :  { %651 = vmatpush1.bf16.xpose.msra.mxu0 %v874_v22 }
  0x48   :  { %766 = vmatprep.subr.msk.bf16.mxu0 %vm226_vm0, %v875_v23 }
  0x49   :  { %308 = vmatmul.mubr.bf16.gmra.mrb[12].mxu0 %v877_v24 }
  0x4a   :  { %748 = vmatprep.mubr.msk.bf16.mxu0 %vm226_vm0, %v878_v25 }
  0x4f   :  { %653 = vmatpush1.bf16.xpose.msra.mxu0 %v877_v24 }
  0x50   :  { %767 = vmatprep.subr.msk.bf16.mxu0 %vm226_vm0, %v878_v25 }
  0x51   :  { %316 = vmatmul.mubr.bf16.gmra.mrb[16].mxu0 %v880_v26 }
  0x52   :  { %749 = vmatprep.mubr.msk.bf16.mxu0 %vm226_vm0, %v881_v27 }
  0x57   :  { %655 = vmatpush1.bf16.xpose.msra.mxu0 %v880_v26 }
  0x58   :  { %768 = vmatprep.subr.msk.bf16.mxu0 %vm226_vm0, %v881_v27 }
  0x59   :  { %324 = vmatmul.mubr.bf16.gmra.mrb[20].mxu0 %v883_v28 }
  0x5a   :  { %750 = vmatprep.mubr.msk.bf16.mxu0 %vm226_vm0, %v884_v29 }
  0x5f   :  { %657 = vmatpush1.bf16.xpose.msra.mxu0 %v883_v28 }
  0x60   :  { %769 = vmatprep.subr.msk.bf16.mxu0 %vm226_vm0, %v884_v29 }
  0x61   :  { %332 = vmatmul.mubr.bf16.gmra.mrb[24].mxu0 %v886_v30 }
  0x62   :  { %751 = vmatprep.mubr.msk.bf16.mxu0 %vm226_vm0, %v887_v31 }
  0x67   :  { %659 = vmatpush1.bf16.xpose.msra.mxu0 %v886_v30 }
  0x68   :  { %770 = vmatprep.subr.msk.bf16.mxu0 %vm226_vm0, %v887_v31 }
  0x69   :  { %340 = vmatmul.mubr.bf16.gmra.mrb[28].mxu0 %v889_v32 }
  0x6f   :  { %661 = vmatpush1.bf16.xpose.msra.mxu0 %v889_v32 }
 0x104   :  { %v285_v38 = vpop.f32.mrb[0].mxu0 }
 0x105   :  { %v286_v39 = vadd.f32 %v1107_v37, %v285_v38  ;;  %v287_v40 = vpop.f32.mrb[1].mxu0 }
 0x106   :  { %v288_v41 = vpop.f32.mrb[2].mxu0 }
 0x107   :  { %v289_v42 = vadd.f32 %v1107_v37, %v288_v41  ;;  %v290_v43 = vpop.f32.mrb[3].mxu0  ;;  %v348_v44 = vmax.f32 %v286_v39, 0.0 }
 0x109   :  { %v349_v45 = vmax.f32 %v289_v42, 0.0 }
 0x10b   :  { %v364_v46 = vpack.c.bf16 %v349_v45, %v348_v44 }
 0x10c   :  { %v293_v47 = vpop.f32.mrb[4].mxu0 }
 0x10d   :  { %v294_v48 = vadd.f32 %v1107_v37, %v293_v47  ;;  %v295_v49 = vpop.f32.mrb[5].mxu0  ;;  %814 = vmatprep.mubr.bf16.mxu1 %v364_v46  ;;  %v927_v47 = vmov 0.0  }
 0x10e   :  { %v296_v50 = vpop.f32.mrb[6].mxu0  ;;  %830 = vmatprep.subr.bf16.mxu1 %v927_v47 }
 0x10f   :  { %v297_v51 = vadd.f32 %v1107_v37, %v296_v50  ;;  %v298_v52 = vpop.f32.mrb[7].mxu0  ;;  %v350_v53 = vmax.f32 %v294_v48, 0.0  ;;  %v762_v48 = vld.sshfl [vmem:[%s1195_s6] sm:$0x33 pattern:$0x76325410] }
 0x110   :  { %v641_v49 = vcombine.high %v762_v48, %v762_v48 }
 0x111   :  { %v351_v54 = vmax.f32 %v297_v51, 0.0 }
 0x112   :  { %771 = vmatprep.mubr.msk.bf16.mxu0 %vm226_vm0, %v641_v49 }
 0x113   :  { %v365_v55 = vpack.c.bf16 %v351_v54, %v350_v53  ;;  %679 = vmatmul.mubr.bf16.vlgmr.msra.gmra.mrb[32].mxu0 %v762_v48 }
 0x114   :  { %v301_v56 = vpop.f32.mrb[8].mxu0 }
 0x115   :  { %v302_v57 = vadd.f32 %v1107_v37, %v301_v56  ;;  %v303_v58 = vpop.f32.mrb[9].mxu0  ;;  %815 = vmatmul.mubr.bf16.vlgmr.msra.gmra.mrb[0].mxu1 %v365_v55 }
 0x116   :  { %v304_v59 = vpop.f32.mrb[10].mxu0 }
 0x117   :  { %v305_v60 = vadd.f32 %v1107_v37, %v304_v59  ;;  %v306_v61 = vpop.f32.mrb[11].mxu0  ;;  %v352_v62 = vmax.f32 %v302_v57, 0.0 }
 0x119   :  { %v353_v63 = vmax.f32 %v305_v60, 0.0 }
 0x11b   :  { %v366_v0 = vpack.c.bf16 %v353_v63, %v352_v62 }
 0x11c   :  { %v309_v1 = vpop.f32.mrb[12].mxu0 }
 0x11d   :  { %v310_v2 = vadd.f32 %v1107_v37, %v309_v1  ;;  %v311_v3 = vpop.f32.mrb[13].mxu0  ;;  %818 = vmatprep.mubr.bf16.mxu1 %v366_v0 }
 0x11e   :  { %v312_v4 = vpop.f32.mrb[14].mxu0 }
 0x11f   :  { %v313_v5 = vadd.f32 %v1107_v37, %v312_v4  ;;  %v314_v6 = vpop.f32.mrb[15].mxu0  ;;  %v354_v7 = vmax.f32 %v310_v2, 0.0 }
 0x121   :  { %v355_v8 = vmax.f32 %v313_v5, 0.0 }
 0x123   :  { %v367_v9 = vpack.c.bf16 %v355_v8, %v354_v7 }
 0x124   :  { %v317_v10 = vpop.f32.mrb[16].mxu0 }
 0x125   :  { %v318_v11 = vadd.f32 %v1107_v37, %v317_v10  ;;  %v319_v12 = vpop.f32.mrb[17].mxu0  ;;  %819 = vmatmul.mubr.bf16.gmra.mrb[4].mxu1 %v367_v9 }
 0x126   :  { %v320_v13 = vpop.f32.mrb[18].mxu0 }
 0x127   :  { %v321_v14 = vadd.f32 %v1107_v37, %v320_v13  ;;  %v322_v15 = vpop.f32.mrb[19].mxu0  ;;  %v356_v16 = vmax.f32 %v318_v11, 0.0 }
 0x129   :  { %v357_v17 = vmax.f32 %v321_v14, 0.0 }
 0x12b   :  { %v368_v18 = vpack.c.bf16 %v357_v17, %v356_v16 }
 0x12c   :  { %v325_v19 = vpop.f32.mrb[20].mxu0 }
 0x12d   :  { %v326_v20 = vadd.f32 %v1107_v37, %v325_v19  ;;  %v327_v21 = vpop.f32.mrb[21].mxu0  ;;  %822 = vmatprep.mubr.bf16.mxu1 %v368_v18 }
 0x12e   :  { %v328_v22 = vpop.f32.mrb[22].mxu0 }
 0x12f   :  { %v329_v23 = vadd.f32 %v1107_v37, %v328_v22  ;;  %v330_v24 = vpop.f32.mrb[23].mxu0  ;;  %v358_v25 = vmax.f32 %v326_v20, 0.0 }
 0x131   :  { %v359_v26 = vmax.f32 %v329_v23, 0.0 }
 0x133   :  { %v369_v27 = vpack.c.bf16 %v359_v26, %v358_v25 }
 0x134   :  { %v333_v28 = vpop.f32.mrb[24].mxu0 }
 0x135   :  { %v334_v29 = vadd.f32 %v1107_v37, %v333_v28  ;;  %v335_v30 = vpop.f32.mrb[25].mxu0  ;;  %823 = vmatmul.mubr.bf16.gmra.mrb[8].mxu1 %v369_v27 }
 0x136   :  { %v336_v31 = vpop.f32.mrb[26].mxu0 }
 0x137   :  { %v337_v32 = vadd.f32 %v1107_v37, %v336_v31  ;;  %v338_v33 = vpop.f32.mrb[27].mxu0  ;;  %v360_v34 = vmax.f32 %v334_v29, 0.0 }
 0x139   :  { %v361_v35 = vmax.f32 %v337_v32, 0.0 }
 0x13b   :  { %v370_v36 = vpack.c.bf16 %v361_v35, %v360_v34 }
 0x13c   :  { %v341_v38 = vpop.f32.mrb[28].mxu0 }
 0x13d   :  { %v342_v39 = vadd.f32 %v1107_v37, %v341_v38  ;;  %v343_v40 = vpop.f32.mrb[29].mxu0  ;;  %826 = vmatprep.mubr.bf16.mxu1 %v370_v36 }
 0x13e   :  { %v344_v41 = vpop.f32.mrb[30].mxu0 }
 0x13f   :  { %v345_v42 = vadd.f32 %v1107_v37, %v344_v41  ;;  %v346_v43 = vpop.f32.mrb[31].mxu0  ;;  %v362_v44 = vmax.f32 %v342_v39, 0.0  ;;  %v1134_v37 = vld [vmem:[%s1194_s5] ss:$0 sm:$0xff] }
 0x141   :  { %v363_v45 = vmax.f32 %v345_v42, 0.0 }
 0x143   :  { %v371_v46 = vpack.c.bf16 %v363_v45, %v362_v44 }
 0x145   :  { %827 = vmatmul.mubr.bf16.gmra.mrb[12].mxu1 %v371_v46 }
 0x146   :  { %846 = vmatprep.mubr.msk.bf16.mxu1 %vm928_vm1, %v927_v47 }
 0x1e8   :  { %v816_v50 = vpop.f32.mrb[0].mxu1 }
 0x1e9   :  { %v486_v51 = vadd.f32 %v816_v50, %v1134_v37  ;;  %v477_v52 = vpop.f32.mrb[1].mxu1 }
 0x1ea   :  { %v478_v53 = vadd.f32 %v1134_v37, %v477_v52  ;;  %v817_v54 = vpop.f32.mrb[2].mxu1  ;;  %v680_v52 = vpop.f32.mrb[32].mxu0 }
 0x1eb   :  { %v489_v55 = vadd.f32 %v817_v54, %v1134_v37  ;;  %v480_v56 = vpop.f32.mrb[3].mxu1  ;;  %v542_v58 = vmax.f32 %v486_v51, 0.0 }
 0x1ec   :  { %v481_v57 = vadd.f32 %v1134_v37, %v480_v56  ;;  %v540_v60 = vmax.f32 %v478_v53, 0.0  ;;  %v682_v53 = vpop.f32.mrb[33].mxu0 }
 0x1ed   :  { %v543_v59 = vmax.f32 %v489_v55, 0.0  ;;  %v683_v54 = vpop.f32.mrb[34].mxu0 }
 0x1ee   :  { %v541_v61 = vmax.f32 %v481_v57, 0.0  ;;  %v684_v55 = vpop.f32.mrb[35].mxu0  ;;  %v687_v57 = vstv %s1197_s8  ;;  %s902_s8 = scalar_lea.vmem %s708_s23, 64 }
 0x1ef   :  { %v557_v62 = vpack.c.bf16 %v543_v59, %v542_v58  ;;  %p903_p0 = scmp.ne.s32.totalorder %s708_s23, %s902_s8  ;;  %p908_p2 = scmp.lt.s32.totalorder %s902_s8, %s902_s8 }
 0x1f0   :  { %v556_v63 = vpack.c.bf16 %v541_v61, %v540_v60 }
 0x1f1   :  { %v573_v6 = vsel %vm226_vm0, %v557_v62, 0  ;;  %p909_p3 = por %p908_p2, %p907_p1 }
 0x1f2   :  { %v570_v0 = vsel %vm226_vm0, %v556_v63, 0 }
 0x1f3   :  { %831 = vmatpush3.bf16.xpose.msra.mxu1 %v570_v0  ;;  %p910_p4 = pnand %p909_p3, %p903_p0 }
 0x1f4   :  { %832 = vmatprep.subr.bf16.mxu1 %v927_v47 }
 0x1f8   :  { %v820_v1 = vpop.f32.mrb[4].mxu1 }
 0x1f9   :  { %v502_v2 = vadd.f32 %v820_v1, %v1134_v37  ;;  %v493_v3 = vpop.f32.mrb[5].mxu1  ;;  %v695_v1 = vld [vmem:[%s1190_s1] sm:$0xf] }
 0x1fa   :  { %v494_v4 = vadd.f32 %v1134_v37, %v493_v3  ;;  %v821_v5 = vpop.f32.mrb[6].mxu1  ;;  %vm696_vm2 = vcmp.ge.s32.totalorder %v695_v1, 0  ;;  %vm697_vm3 = vcmp.lt.s32.totalorder %v695_v1, 3 }
 0x1fb   :  { %v505_v7 = vadd.f32 %v821_v5, %v1134_v37  ;;  %v496_v8 = vpop.f32.mrb[7].mxu1  ;;  %833 = vmatpush3.bf16.xpose.msra.mxu1 %v573_v6  ;;  %v546_v10 = vmax.f32 %v502_v2, 0.0  ;;  %vm698_vm4 = vmand %vm696_vm2, %vm697_vm3 }
 0x1fc   :  { %v497_v9 = vadd.f32 %v1134_v37, %v496_v8  ;;  %834 = vmatprep.subr.bf16.mxu1 %v927_v47  ;;  %v544_v12 = vmax.f32 %v494_v4, 0.0 }
 0x1fd   :  { %v547_v11 = vmax.f32 %v505_v7, 0.0 }
 0x1fe   :  { %v545_v13 = vmax.f32 %v497_v9, 0.0 }
 0x1ff   :  { %v559_v14 = vpack.c.bf16 %v547_v11, %v546_v10 }
 0x200   :  { %v558_v15 = vpack.c.bf16 %v545_v13, %v544_v12 }
 0x201   :  { %v579_v22 = vsel %vm226_vm0, %v559_v14, 0 }
 0x202   :  { %v576_v16 = vsel %vm226_vm0, %v558_v15, 0 }
 0x203   :  { %835 = vmatpush3.bf16.xpose.msra.mxu1 %v576_v16 }
 0x204   :  { %836 = vmatprep.subr.bf16.mxu1 %v927_v47 }
 0x208   :  { %v824_v17 = vpop.f32.mrb[8].mxu1 }
 0x209   :  { %v518_v18 = vadd.f32 %v824_v17, %v1134_v37  ;;  %v509_v19 = vpop.f32.mrb[9].mxu1 }
 0x20a   :  { %v510_v20 = vadd.f32 %v1134_v37, %v509_v19  ;;  %v825_v21 = vpop.f32.mrb[10].mxu1 }
 0x20b   :  { %v521_v23 = vadd.f32 %v825_v21, %v1134_v37  ;;  %v512_v24 = vpop.f32.mrb[11].mxu1  ;;  %837 = vmatpush3.bf16.xpose.msra.mxu1 %v579_v22  ;;  %v550_v26 = vmax.f32 %v518_v18, 0.0 }
 0x20c   :  { %v513_v25 = vadd.f32 %v1134_v37, %v512_v24  ;;  %838 = vmatprep.subr.bf16.mxu1 %v927_v47  ;;  %v548_v28 = vmax.f32 %v510_v20, 0.0 }
 0x20d   :  { %v551_v27 = vmax.f32 %v521_v23, 0.0 }
 0x20e   :  { %v549_v29 = vmax.f32 %v513_v25, 0.0 }
 0x20f   :  { %v561_v30 = vpack.c.bf16 %v551_v27, %v550_v26 }
 0x210   :  { %v560_v31 = vpack.c.bf16 %v549_v29, %v548_v28 }
 0x211   :  { %v585_v39 = vsel %vm226_vm0, %v561_v30, 0 }
 0x212   :  { %v582_v32 = vsel %vm226_vm0, %v560_v31, 0 }
 0x213   :  { %839 = vmatpush3.bf16.xpose.msra.mxu1 %v582_v32 }
 0x214   :  { %840 = vmatprep.subr.bf16.mxu1 %v927_v47 }
 0x218   :  { %v828_v33 = vpop.f32.mrb[12].mxu1 }
 0x219   :  { %v534_v34 = vadd.f32 %v828_v33, %v1134_v37  ;;  %v525_v35 = vpop.f32.mrb[13].mxu1 }
 0x21a   :  { %v526_v36 = vadd.f32 %v1134_v37, %v525_v35  ;;  %v829_v38 = vpop.f32.mrb[14].mxu1 }
 0x21b   :  { %v537_v40 = vadd.f32 %v829_v38, %v1134_v37  ;;  %v528_v41 = vpop.f32.mrb[15].mxu1  ;;  %841 = vmatpush3.bf16.xpose.msra.mxu1 %v585_v39  ;;  %v554_v43 = vmax.f32 %v534_v34, 0.0 }
 0x21c   :  { %v529_v42 = vadd.f32 %v1134_v37, %v528_v41  ;;  %842 = vmatprep.subr.bf16.mxu1 %v927_v47  ;;  %v552_v45 = vmax.f32 %v526_v36, 0.0  ;;  %v565_v37 = vld [vmem:[%s1196_s7] sm:$0x3] }
 0x21d   :  { %v555_v44 = vmax.f32 %v537_v40, 0.0 }
 0x21e   :  { %v553_v46 = vmax.f32 %v529_v42, 0.0 }
 0x21f   :  { %v563_v48 = vpack.c.bf16 %v555_v44, %v554_v43 }
 0x220   :  { %v562_v49 = vpack.c.bf16 %v553_v46, %v552_v45 }
 0x221   :  { %v591_v51 = vsel %vm226_vm0, %v563_v48, 0 }
 0x222   :  { %v588_v50 = vsel %vm226_vm0, %v562_v49, 0 }
 0x223   :  { %843 = vmatpush3.bf16.xpose.msra.mxu1 %v588_v50 }
 0x224   :  { %844 = vmatprep.subr.bf16.mxu1 %v927_v47 }
 0x22b   :  { %845 = vmatpush3.bf16.xpose.msra.mxu1 %v591_v51 }
 0x232   :  { %847 = vmatmul.mubr.msk.bf16.vlgmr.msra.gmra.mrb[16].mxu1 %vm226_vm0, %v565_v37 }
 0x305   :  { %v627_v56 = vpop.f32.mrb[16].mxu1 }
 0x306   :  { %v681_v58 = vadd.f32 %v680_v52, %v627_v56  ;;  %v848_v47 = vpop.f32.mrb[17].mxu1 }
 0x307   :  { %v630_v59 = vpop.f32.mrb[18].mxu1 }
 0x308   :  { %v688_v60 = vadd.f32 %v687_v57, %v681_v58  ;;  %v849_v61 = vpop.f32.mrb[19].mxu1 }
 0x30a   :  { %v772_v62 = vmul.f32 -1.442695, %v688_v60 }
 0x30c   :  { %898 = vpow2.f32 %v772_v62 }
 0x316   :  { %v899_v63 = vpop.eup %898 }
 0x317   :  { %v692_v0 = vadd.f32 1.0, %v899_v63 }
 0x319   :  { %900 = vrcp.f32 %v692_v0 }
 0x323   :  { %v901_v2 = vpop.eup %900 }
 0x324   :  { %v699_v3 = vsel %vm698_vm4, %v901_v2, 0.0 }
 0x325   :  { %700 = vst [vmem:[#allocation3] sm:$0xf] %v699_v3 }
 0x326   :  { %913 = shalt.err (!%p910_p4)
}
 0x327   :  { %s914_s1 = scalar_lea.hbm %s1198_s9, 64 }
 0x328   :  { %p915_p5 = scmp.ne.s32.totalorder %s1198_s9, %s914_s1  ;;  %p918_p6 = scmp.lt.u32.totalorder %s914_s1, %s1198_s9 }
 0x32a   :  { %p920_p7 = pnand %p918_p6, %p915_p5 }
 0x32c   :  { %923 = shalt.err (!%p920_p7)
}
 0x32d   :  { %710 = dma.vmem_to_hbm [thread:$0]  %s708_s23, 64, %s1198_s9, [#allocation4]  }
 0x32e   :  { %924 = dma.done.wait [#allocation4], 64  }
 0x32f   :  { %925 = vsyncadd [#allocation4], 4294967232 }
 0x330   :  { %714 = vsyncpa [#allocation4], 1 }

</bundles_post_ra>
